<compile_context>
chip_gen: v5e
topology: v5e:2x2
jax: 0.10.0
libtpu: 0.0.40
codegen_flags: <defaults>
</compile_context>

<pallas_src>
import jax
import jax.numpy as jnp
from jax.experimental import pallas as pl
from jax.experimental.pallas import tpu as pltpu

P_PAD = 128  # each projection's output padded to a full lane width


def attention_kernel(dec_ref, lis_ref, w_cat_ref, b_cat_ref, out_ref):
    B, T, D = lis_ref.shape
    Bpad = dec_ref.shape[0]              # decoder rows, padded to a multiple of 8
    Pp = w_cat_ref.shape[1] // 2         # = P_PAD

    lis = lis_ref[...]                                          # (B, T, D)
    lis_flat = lis.reshape(B * T, D)                            # (B*T, D), T mult. of 8

    # --- fused phi/psi projection: one MXU matmul over [decoder rows | listener rows]
    x_cat = jnp.concatenate([dec_ref[...], lis_flat], axis=0)   # (Bpad + B*T, D)
    y = jnp.maximum(
        jnp.dot(x_cat, w_cat_ref[...], preferred_element_type=jnp.float32)
        + b_cat_ref[...], 0.0)                                  # (Bpad + B*T, 2*Pp)

    cd = y[:B, :Pp]                                   # (B, Pp)     relu(phi(dec))
    cl = y[Bpad:, Pp:].reshape(B, T, Pp)              # (B, T, Pp)  relu(psi(lis))

    # --- energy[b,t] = sum_p cd[b,p]*cl[b,t,p]  (VPU mul + lane reduce; keeps the
    #     MXU FIFO off the serial chain; zero-padded lanes contribute exactly 0)
    energy = jnp.sum(cd[:, None, :] * cl, axis=-1)              # (B, T)

    # --- numerically stable softmax over time; EUP reciprocal off the VALU path
    m = jnp.max(energy, axis=-1, keepdims=True)
    e = jnp.exp(energy - m)
    attn = e * pl.reciprocal(jnp.sum(e, axis=-1, keepdims=True), approx=False)

    # --- ctx[b,d] = sum_t attn[b,t]*lis[b,t,d]  (VPU mul + sublane reduce)
    ctx = jnp.sum(attn[:, :, None] * lis, axis=1)               # (B, D)

    # --- single packed output slab: slab 0 = attn (lanes [0:T]), slab 1 = ctx ([0:D])
    out_ref[...] = jnp.zeros_like(out_ref)
    out_ref[0, :, :T] = attn.astype(out_ref.dtype)
    out_ref[1, :, :D] = ctx.astype(out_ref.dtype)


def attention_forward(decoder_state, listener_feature, phi_w, phi_b, psi_w, psi_b):
    B, _, D = decoder_state.shape
    _, T, _ = listener_feature.shape
    P = phi_w.shape[1]

    # Sublane-align the decoder rows so the in-kernel row concat is tile-aligned.
    Bpad = ((B + 7) // 8) * 8
    dec_pad = jnp.zeros((Bpad, D), jnp.float32).at[:B].set(decoder_state.reshape(B, D))

    # Fused, lane-padded projection weights / bias (built once, wrapper side):
    #   lanes [0:P] -> phi, lanes [P_PAD:P_PAD+P] -> psi, everything else zero.
    w_cat = jnp.zeros((D, 2 * P_PAD), jnp.float32)
    w_cat = w_cat.at[:, :P].set(phi_w).at[:, P_PAD:P_PAD + P].set(psi_w)
    b_cat = jnp.zeros((1, 2 * P_PAD), jnp.float32)
    b_cat = b_cat.at[:, :P].set(phi_b.reshape(1, P)).at[:, P_PAD:P_PAD + P].set(
        psi_b.reshape(1, P))

    cost = pl.CostEstimate(
        flops=(2 * (Bpad + B * T) * D * (2 * P_PAD)      # fused projection matmul
               + 4 * B * T * P_PAD + 3 * B * T * D),     # energy / softmax / ctx (VPU)
        transcendentals=B * T + B,                       # exp + reciprocal
        bytes_accessed=4 * (Bpad * D + B * T * D + D * 2 * P_PAD + 2 * P_PAD
                            + 2 * B * 128))

    vmem = pl.BlockSpec(memory_space=pltpu.MemorySpace.VMEM)
    packed = pl.pallas_call(
        attention_kernel,
        out_shape=jax.ShapeDtypeStruct((2, B, 128), jnp.float32),
        in_specs=[vmem] * 4,
        out_specs=vmem,
        cost_estimate=cost,
    )(dec_pad, listener_feature, w_cat, b_cat)

    attention_score = packed[0, :, :T]
    context = packed[1, :, :D]

    # Original (non-copula) branch taken (batch <= 3 in this synthetic setting).
    count_original, count_copula = 1, 0
    return attention_score, context, count_original, count_copula


def _reference(decoder_state, listener_feature, phi_w, phi_b, psi_w, psi_b):
    cd = jnp.maximum(jnp.einsum('bod,dp->bop', decoder_state, phi_w) + phi_b, 0.0)
    cl = jnp.maximum(jnp.einsum('btd,dp->btp', listener_feature, psi_w) + psi_b, 0.0)
    energy = jnp.einsum('bop,btp->bot', cd, cl)[:, 0, :]
    attn = jax.nn.softmax(energy, axis=-1)
    ctx = jnp.sum(listener_feature * attn[:, :, None], axis=1)
    return attn, ctx


if __name__ == "__main__":
    B, T = 2, 8                 # batch, listener time steps
    D = 32                      # input_feature_dim
    P = 16                      # preprocess_mlp_dim

    key = jax.random.PRNGKey(0)
    k1, k2, k3, k4, k5, k6 = jax.random.split(key, 6)

    decoder_state = jax.random.normal(k1, (B, 1, D), dtype=jnp.float32)
    listener_feature = jax.random.normal(k2, (B, T, D), dtype=jnp.float32)

    # Deterministic PyTorch-style Linear init: U(-1/sqrt(in), 1/sqrt(in)).
    bound = 1.0 / (D ** 0.5)
    phi_w = jax.random.uniform(k3, (D, P), jnp.float32, -bound, bound)
    phi_b = jax.random.uniform(k4, (1, P), jnp.float32, -bound, bound)
    psi_w = jax.random.uniform(k5, (D, P), jnp.float32, -bound, bound)
    psi_b = jax.random.uniform(k6, (1, P), jnp.float32, -bound, bound)

    attn, ctx, count_original, count_copula = attention_forward(
        decoder_state, listener_feature, phi_w, phi_b, psi_w, psi_b)
    jax.block_until_ready((attn, ctx))

    attn_ref, ctx_ref = _reference(
        decoder_state, listener_feature, phi_w, phi_b, psi_w, psi_b)
    assert jnp.allclose(attn, attn_ref, atol=1e-5, rtol=1e-5), "attention mismatch"
    assert jnp.allclose(ctx, ctx_ref, atol=1e-5, rtol=1e-5), "context mismatch"
    assert count_original == 1 and count_copula == 0

    print("KERNEL_OK")
</pallas_src>

<mosaic_0001>
module attributes {stable_mosaic.version = 11 : i64} {
  func.func @attention_kernel(%arg0: memref<8x32xf32, #tpu.memory_space<vmem>>, %arg1: memref<2x8x32xf32, #tpu.memory_space<vmem>>, %arg2: memref<32x256xf32, #tpu.memory_space<vmem>>, %arg3: memref<1x256xf32, #tpu.memory_space<vmem>>, %arg4: memref<2x2x128xf32, #tpu.memory_space<vmem>>) attributes {dimension_semantics = [], scalar_prefetch = 0 : i64, scratch_operands = 0 : i64, tpu.core_type = #tpu.core_type<tc>} {
    %c0 = arith.constant 0 : index
    %c0_0 = arith.constant 0 : index
    %c0_1 = arith.constant 0 : index
    %0 = vector.load %arg1[%c0, %c0_0, %c0_1] : memref<2x8x32xf32, #tpu.memory_space<vmem>>, vector<2x8x32xf32>
    %1 = vector.shape_cast %0 : vector<2x8x32xf32> to vector<16x32xf32>
    %c0_2 = arith.constant 0 : index
    %c0_3 = arith.constant 0 : index
    %2 = vector.load %arg0[%c0_2, %c0_3] : memref<8x32xf32, #tpu.memory_space<vmem>>, vector<8x32xf32>
    %3 = tpu.concatenate %2, %1 in 0 : vector<8x32xf32>, vector<16x32xf32> -> vector<24x32xf32>
    %c0_4 = arith.constant 0 : index
    %c0_5 = arith.constant 0 : index
    %4 = vector.load %arg2[%c0_4, %c0_5] : memref<32x256xf32, #tpu.memory_space<vmem>>, vector<32x256xf32>
    %cst = arith.constant dense<0.000000e+00> : vector<24x256xf32>
    %5 = tpu.matmul %3, %4, %cst {dimension_numbers = #tpu.dot_dimension_numbers<[1], [0], [0], [1], [0, 0, 1, 1], [], []>} : vector<24x32xf32>, vector<32x256xf32>, vector<24x256xf32> -> vector<24x256xf32>
    %c0_6 = arith.constant 0 : index
    %c0_7 = arith.constant 0 : index
    %6 = vector.load %arg3[%c0_6, %c0_7] : memref<1x256xf32, #tpu.memory_space<vmem>>, vector<1x256xf32>
    %7 = vector.broadcast %6 : vector<1x256xf32> to vector<24x256xf32>
    %8 = arith.addf %5, %7 : vector<24x256xf32>
    %cst_8 = arith.constant 0.000000e+00 : f32
    %9 = vector.broadcast %cst_8 : f32 to vector<24x256xf32>
    %10 = arith.maximumf %8, %9 : vector<24x256xf32>
    %11 = vector.extract_strided_slice %10 {offsets = [0, 0], sizes = [2, 128], strides = [1, 1]} : vector<24x256xf32> to vector<2x128xf32>
    %12 = vector.extract_strided_slice %10 {offsets = [8, 128], sizes = [16, 128], strides = [1, 1]} : vector<24x256xf32> to vector<16x128xf32>
    %13 = vector.shape_cast %12 : vector<16x128xf32> to vector<2x8x128xf32>
    %14 = vector.shape_cast %11 : vector<2x128xf32> to vector<2x1x128xf32>
    %15 = vector.broadcast %14 : vector<2x1x128xf32> to vector<2x8x128xf32>
    %16 = arith.mulf %15, %13 : vector<2x8x128xf32>
    %cst_9 = arith.constant dense<0.000000e+00> : vector<2x8xf32>
    %17 = vector.multi_reduction <add>, %16, %cst_9 [2] : vector<2x8x128xf32> to vector<2x8xf32>
    %cst_10 = arith.constant dense<0xFF800000> : vector<2xf32>
    %18 = vector.multi_reduction <maximumf>, %17, %cst_10 [1] : vector<2x8xf32> to vector<2xf32>
    %19 = vector.shape_cast %18 : vector<2xf32> to vector<2x1xf32>
    %20 = vector.broadcast %19 : vector<2x1xf32> to vector<2x8xf32>
    %21 = arith.subf %17, %20 : vector<2x8xf32>
    %22 = math.exp %21 : vector<2x8xf32>
    %cst_11 = arith.constant dense<0.000000e+00> : vector<2xf32>
    %23 = vector.multi_reduction <add>, %22, %cst_11 [1] : vector<2x8xf32> to vector<2xf32>
    %24 = vector.shape_cast %23 : vector<2xf32> to vector<2x1xf32>
    %25 = tpu.reciprocal %24 : vector<2x1xf32> -> vector<2x1xf32>
    %26 = vector.broadcast %25 : vector<2x1xf32> to vector<2x8xf32>
    %27 = arith.mulf %22, %26 : vector<2x8xf32>
    %28 = vector.shape_cast %27 : vector<2x8xf32> to vector<2x8x1xf32>
    %29 = vector.broadcast %28 : vector<2x8x1xf32> to vector<2x8x32xf32>
    %30 = arith.mulf %29, %0 : vector<2x8x32xf32>
    %cst_12 = arith.constant dense<0.000000e+00> : vector<2x32xf32>
    %31 = vector.multi_reduction <add>, %30, %cst_12 [1] : vector<2x8x32xf32> to vector<2x32xf32>
    %cst_13 = arith.constant 0.000000e+00 : f32
    %32 = vector.broadcast %cst_13 : f32 to vector<2x2x128xf32>
    %c0_14 = arith.constant 0 : index
    %c0_15 = arith.constant 0 : index
    %c0_16 = arith.constant 0 : index
    %33 = vector.load %arg4[%c0_14, %c0_15, %c0_16] : memref<2x2x128xf32, #tpu.memory_space<vmem>>, vector<2x2x128xf32>
    tpu.vector_store %arg4[%c0_14, %c0_15, %c0_16], %32 {strides = array<i32>} : memref<2x2x128xf32, #tpu.memory_space<vmem>>, vector<2x2x128xf32>,
    %c0_17 = arith.constant 0 : index
    %c0_18 = arith.constant 0 : index
    %c0_19 = arith.constant 0 : index
    %34 = vector.load %arg4[%c0_17, %c0_18, %c0_19] : memref<2x2x128xf32, #tpu.memory_space<vmem>>, vector<1x2x8xf32>
    %35 = vector.shape_cast %34 : vector<1x2x8xf32> to vector<2x8xf32>
    %36 = vector.shape_cast %27 : vector<2x8xf32> to vector<1x2x8xf32>
    tpu.vector_store %arg4[%c0_17, %c0_18, %c0_19], %36 {strides = array<i32>} : memref<2x2x128xf32, #tpu.memory_space<vmem>>, vector<1x2x8xf32>,
    %c1 = arith.constant 1 : index
    %c0_20 = arith.constant 0 : index
    %c0_21 = arith.constant 0 : index
    %37 = vector.load %arg4[%c1, %c0_20, %c0_21] : memref<2x2x128xf32, #tpu.memory_space<vmem>>, vector<1x2x32xf32>
    %38 = vector.shape_cast %37 : vector<1x2x32xf32> to vector<2x32xf32>
    %39 = vector.shape_cast %31 : vector<2x32xf32> to vector<1x2x32xf32>
    tpu.vector_store %arg4[%c1, %c0_20, %c0_21], %39 {strides = array<i32>} : memref<2x2x128xf32, #tpu.memory_space<vmem>>, vector<1x2x32xf32>,
    return
  }
}

</mosaic_0001>

<bundles_post_ra>
// kernel: tpu_custom_call.1
= control target key start
LH: loop header
LB: loop body
LE: loop exit
PB: predicated region body
PF: predicated region fallthrough
CT: control target
= control target key end

     0   :  { %9 = vsyncpa [#allocation3], 0  ;;  %s496_s0 = inlined_call_operand.hbm [shape: f32[8,32], index: 0, kind: input, shape index: {}]   ;;  %s497_s1 = inlined_call_operand.hbm [shape: f32[2,8,32], index: 1, kind: input, shape index: {}]   ;;  %s498_s2 = inlined_call_operand.hbm [shape: f32[32,256], index: 2, kind: input, shape index: {}]   ;;  %s499_s3 = inlined_call_operand.vmem [shape: f32[1,256], index: 3, kind: input, shape index: {}]   ;;  %s500_s4 = inlined_call_operand.hbm [shape: f32[2,2,128], index: 4, kind: output, shape index: {}]  }
   0x1   :  { %10 = vsyncpa [#allocation6], 0  ;;  %s27_s17 = sshll.u32 %s497_s1, 4  ;;  %s28_s17 = int_to_ptr.hbm [resolvable:$true] %s27_s17 }
   0x2   :  { %11 = vsyncpa [#allocation4], 0  ;;  %s411_s18 = smov [#allocation5]   ;;  %s17_s22 = sshll.u32 %s496_s0, 4  ;;  %s18_s22 = int_to_ptr.hbm [resolvable:$true] %s17_s22 }
   0x3   :  { %s29_s19 = sshll.u32 %s411_s18, 4  ;;  %s412_s23 = smov 128   ;;  %s30_s19 = int_to_ptr.vmem [resolvable:$true] %s29_s19 }
   0x4   :  { %s413_s24 = smov 8   ;;  %s414_s25 = smov [#allocation2]  }
   0x5   :  { %35 = dma.hbm_to_vmem [thread:$0]  %s28_s17, 256, %s30_s19, [#allocation6], %s412_s23, %s412_s23, %s413_s24  }
   0x6   :  { %s19_s26 = sshll.u32 %s414_s25, 4  ;;  %s40_s29 = sshll.u32 %s498_s2, 4  ;;  %s20_s26 = int_to_ptr.vmem [resolvable:$true] %s19_s26  ;;  %s41_s29 = int_to_ptr.hbm [resolvable:$true] %s40_s29 }
   0x7   :  { %22 = dma.hbm_to_vmem [thread:$0]  %s18_s22, 128, %s20_s26, [#allocation3]  }
   0x8   :  { %s415_s1 = smov [#allocation7]   ;;  %s416_s5 = smov 256  }
   0x9   :  { %s42_s30 = sshll.u32 %s415_s1, 4  ;;  %s417_s6 = smov 16   ;;  %s43_s30 = int_to_ptr.vmem [resolvable:$true] %s42_s30 }
   0xa   :  { %48 = dma.hbm_to_vmem [thread:$0]  %s41_s29, 1024, %s43_s30, [#allocation6], %s416_s5, %s416_s5, %s417_s6  }
   0xb   :  { %405 = dma.done.wait [#allocation3], 128  }
   0xc   :  { %406 = vsyncadd [#allocation3], 4294967168 }
   0xd   :  { %407 = dma.done.wait [#allocation6], 1280  }
   0xe   :  { %408 = vsyncadd [#allocation6], 4294966016  ;;  %v73_v0 = vld [vmem:[#allocation7 + $0x38] sm:$0xff]  ;;  %v71_v1 = vld [vmem:[#allocation7 + $0x28] sm:$0xff]  ;;  %vm80_vm0 = vcmask 261120   ;;  %v156_v32 = vlaneseq  ;;  %vm160_vm1 = vcmask 1041409  }
   0xf   :  { %v72_v2 = vld [vmem:[#allocation7 + $0x30] sm:$0xff]  ;;  %284 = vmatpush.msra.mxu3 %v73_v0  ;;  %v70_v3 = vld [vmem:[#allocation7 + $0x20] sm:$0xff]  ;;  %v69_v4 = vld [vmem:[#allocation7 + $0x18] sm:$0xff]  ;;  %126 = vmatpush.msra.mxu1 %v73_v0  ;;  %vm163_vm2 = vcmask 58368   ;;  %v418_v39 = vmov 0   ;;  %s260_s10 = sshll.u32 %s500_s4, 4  ;;  %s261_s10 = int_to_ptr.hbm [resolvable:$true] %s260_s10 }
  0x10   :  { %102 = vmatpush.msra.mxu0 %v72_v2  ;;  %v68_v5 = vld [vmem:[#allocation7 + $0x10] sm:$0xff]  ;;  %280 = vmatpush.msra.mxu2 %v72_v2  ;;  %v67_v6 = vld [vmem:[#allocation7 + $0x8] sm:$0xff]  ;;  %v66_v7 = vld [vmem:[#allocation7] sm:$0xff]  ;;  %v474_v33 = vand.u32 127, %v156_v32  ;;  %vm252_vm7 = vcmask 254976   ;;  %s421_s11 = smov 32  }
  0x11   :  { %285 = vmatpush.msra.mxu3 %v71_v1  ;;  %127 = vmatpush.msra.mxu1 %v71_v1  ;;  %v457_v8 = vld [vmem:[#allocation5] sm:$0xff]  ;;  %v65_v9 = vld [vmem:[#allocation2] sm:$0xff]  ;;  %v465_v10 = vld [vmem:[#allocation5 + $0x8] sm:$0xff]  ;;  %s422_s12 = smov 2  }
  0x12   :  { %103 = vmatpush.msra.mxu0 %v70_v3  ;;  %281 = vmatpush.msra.mxu2 %v70_v3  ;;  %v74_v11 = vld [vmem:[%s499_s3] sm:$0x3]  ;;  %s420_s3 = smov [#allocation8]  }
  0x13   :  { %286 = vmatpush.msra.mxu3 %v69_v4  ;;  %128 = vmatpush.msra.mxu1 %v69_v4  ;;  %v76_v12 = vperm.slane %v74_v11, 0  ;;  %v77_v17 = vperm.slane %v74_v11, 1  ;;  %s258_s7 = sshll.u32 %s420_s3, 4  ;;  %s259_s7 = int_to_ptr.vmem [resolvable:$true] %s258_s7 }
  0x14   :  { %104 = vmatpush.msra.mxu0 %v68_v5  ;;  %282 = vmatpush.msra.mxu2 %v68_v5 }
  0x15   :  { %287 = vmatpush.msra.mxu3 %v67_v6  ;;  %129 = vmatpush.msra.mxu1 %v67_v6  ;;  %v419_v6 = vmov 0.0  }
  0x16   :  { %105 = vmatpush.msra.mxu0 %v66_v7  ;;  %278 = vmatmul.msk.f32.vlgmr.msra.gmra.mxu3 %vm80_vm0, %v457_v8  ;;  %240 = vst [vmem:[#allocation8] sm:$0x3] %v419_v6 }
  0x17   :  { %274 = vmatmul.msk.f32.vlgmr.msra.gmra.mxu0 %vm80_vm0, %v65_v9  ;;  %283 = vmatpush.msra.mxu2 %v66_v7  ;;  %241 = vst [vmem:[#allocation8 + $0x2] sm:$0x3] %v419_v6 }
  0x18   :  { %275 = vmatmul.msk.f32.vlgmr.msra.gmra.mxu2 %vm80_vm0, %v457_v8  ;;  %277 = vmatmul.msk.f32.vlgmr.msra.gmra.mxu1 %vm80_vm0, %v65_v9 }
  0x19   :  { %301 = vset.pattern.permute.xlu2 %v418_v39  ;;  %300 = vset.pattern.permute.xlu1 %v418_v39 }
  0x1a   :  { %302 = vset.pattern.permute.xlu0 %v418_v39 }
  0x1e   :  { %279 = vmatmul.msk.f32.gmra.mxu3 %vm80_vm0, %v465_v10 }
  0x20   :  { %276 = vmatmul.msk.f32.gmra.mxu2 %vm80_vm0, %v465_v10 }
  0x94   :  { %v107_v13 = vpop.f32.mrf.mxu0 }
  0x95   :  { %v108_v14 = vadd.f32 %v107_v13, %v76_v12  ;;  %v131_v15 = vpop.f32.mrf.mxu1 }
  0x97   :  { %v139_v16 = vmax.f32 %v108_v14, 0.0 }
  0x99   :  { %v133_v18 = vpop.f32.mrf.mxu3  ;;  %v144_v20 = vperm.slane %v139_v16, 0  ;;  %v143_v24 = vrot.slane %v139_v16, 1 }
  0x9a   :  { %v134_v19 = vadd.f32 %v133_v18, %v77_v17 }
  0x9b   :  { %v110_v21 = vpop.f32.mrf.mxu2  ;;  %v145_v29 = vperm.slane %v143_v24, 0 }
  0x9c   :  { %v140_v22 = vmax.f32 %v134_v19, 0.0 }
  0x9e   :  { %v148_v23 = vmul.f32 %v144_v20, %v140_v22 }
  0xa0   :  { %150 = vadd.xlane.f32.xlu0 %v148_v23 }
  0xa1   :  { %v136_v25 = vpop.f32.mrf.mxu3 }
  0xa2   :  { %v137_v26 = vadd.f32 %v136_v25, %v77_v17 }
  0xa3   :  { %v112_v27 = vpop.f32.mrf.mxu2 }
  0xa4   :  { %v141_v28 = vmax.f32 %v137_v26, 0.0 }
  0xa6   :  { %v149_v30 = vmul.f32 %v145_v29, %v141_v28 }
  0xa8   :  { %152 = vadd.xlane.f32.xlu0 %v149_v30 }
 0x113   :  { %v151_v31 = vpop.xlane.xlu0 %150 }
 0x114   :  { %v158_v35 = vperm.slane %v151_v31, %v474_v33 }
 0x11b   :  { %v153_v34 = vpop.xlane.xlu0 %152 }
 0x11c   :  { %v159_v36 = vperm.slane %v153_v34, %v474_v33 }
 0x11e   :  { %v161_v37 = vsel %vm160_vm1, %v159_v36, %v158_v35 }
 0x11f   :  { %v164_v38 = vsel %vm163_vm2, %v161_v37, -inf }
 0x120   :  { %165 = vmax.xlane.f32.xlu1 %v164_v38 }
 0x193   :  { %v166_v40 = vpop.xlane.xlu1 %165 }
 0x194   :  { %v168_v41 = vperm.slane %v166_v40, 0  ;;  %v169_v42 = vperm.slane %v166_v40, 1 }
 0x196   :  { %v172_v43 = vsub.f32 %v151_v31, %v168_v41  ;;  %v173_v44 = vsub.f32 %v153_v34, %v169_v42 }
 0x198   :  { %v174_v45 = vmul.f32 1.442695, %v172_v43  ;;  %v176_v46 = vmul.f32 1.442695, %v173_v44 }
 0x19a   :  { %303 = vpow2.f32 %v174_v45 }
 0x19b   :  { %305 = vpow2.f32 %v176_v46 }
 0x1a0   :  { %v304_v47 = vpop.eup %303 }
 0x1a1   :  { %v306_v48 = vpop.eup %305  ;;  %181 = vperm.xlu1 %300, %v304_v47  }
 0x1a2   :  { %184 = vperm.xlu2 %301, %v306_v48  }
 0x1fc   :  { %v185_v49 = vpop.permute.xlu2 %184 }
 0x1fd   :  { %v187_v51 = vperm.slane %v185_v49, %v474_v33 }
 0x213   :  { %v182_v50 = vpop.permute.xlu1 %181 }
 0x214   :  { %v186_v52 = vperm.slane %v182_v50, %v474_v33 }
 0x216   :  { %v188_v53 = vsel %vm160_vm1, %v187_v51, %v186_v52 }
 0x217   :  { %v190_v54 = vsel %vm163_vm2, %v188_v53, 0.0 }
 0x218   :  { %191 = vadd.xlane.f32.xlu2 %v190_v54 }
 0x28b   :  { %v192_v55 = vpop.xlane.xlu2 %191 }
 0x28c   :  { %307 = vrcp.f32 %v192_v55  ;;  %v204_v59 = vand.u32 2147483648, %v192_v55  ;;  %v202_v61 = vand.u32 2147483647, %v192_v55  ;;  %vm198_vm4 = vweird.f32 %v192_v55 }
 0x28e   :  { %v205_v63 = vor.u32 1.1754944e-38, %v204_v59  ;;  %vm203_vm6 = vcmp.eq.f32.partialorder %v202_v61, 8.507059e+37 }
 0x292   :  { %v308_v56 = vpop.eup %307 }
 0x293   :  { %v194_v57 = vmul.f32 %v308_v56, %v192_v55  ;;  %vm199_vm3 = vweird.f32 %v308_v56 }
 0x294   :  { %vm200_vm5 = vmor %vm198_vm4, %vm199_vm3 }
 0x295   :  { %v195_v58 = vsub.f32 1.0, %v194_v57 }
 0x297   :  { %v196_v60 = vmul.f32 %v308_v56, %v195_v58 }
 0x299   :  { %v197_v62 = vadd.f32 %v308_v56, %v196_v60 }
 0x29b   :  { %v201_v0 = vsel %vm200_vm5, %v308_v56, %v197_v62 }
 0x29c   :  { %v206_v1 = vsel %vm203_vm6, %v205_v63, %v201_v0 }
 0x29d   :  { %v209_v2 = vperm.slane %v206_v1, 1  ;;  %v208_v3 = vperm.slane %v206_v1, 0 }
 0x29f   :  { %v213_v4 = vmul.f32 %v306_v48, %v209_v2  ;;  %v212_v5 = vmul.f32 %v304_v47, %v208_v3 }
 0x2a1   :  { %221 = vperm.xlu1 %300, %v213_v4   ;;  %216 = vperm.xlu0 %302, %v212_v5  }
 0x313   :  { %v222_v7 = vpop.permute.xlu1 %221  ;;  %v217_v9 = vpop.permute.xlu0 %216 }
 0x314   :  { %v225_v11 = vmul.f32 %v222_v7, %v465_v10  ;;  %v243_v12 = vperm.slane %v222_v7, %v474_v33  ;;  %v224_v13 = vmul.f32 %v217_v9, %v457_v8  ;;  %v242_v14 = vperm.slane %v217_v9, %v474_v33 }
 0x316   :  { %v233_v15 = vsel %vm80_vm0, %v225_v11, 0.0  ;;  %v226_v16 = vsel %vm80_vm0, %v224_v13, 0.0  ;;  %v244_v17 = vsel %vm160_vm1, %v243_v12, %v242_v14 }
 0x317   :  { %v234_v18 = vrot.slane %v233_v15, 4  ;;  %v227_v19 = vrot.slane %v226_v16, 4  ;;  %246 = vst.msk [vmem:[#allocation8] sm:$0x3] %vm163_vm2, %v244_v17 }
 0x319   :  { %v235_v20 = vadd.f32 %v234_v18, %v233_v15  ;;  %v228_v21 = vadd.f32 %v227_v19, %v226_v16 }
 0x31b   :  { %v236_v22 = vrot.slane %v235_v20, 2  ;;  %v229_v10 = vrot.slane %v228_v21, 2 }
 0x31d   :  { %v237_v23 = vadd.f32 %v236_v22, %v235_v20  ;;  %v230_v24 = vadd.f32 %v229_v10, %v228_v21 }
 0x31f   :  { %v238_v8 = vrot.slane %v237_v23, 1  ;;  %v231_v25 = vrot.slane %v230_v24, 1 }
 0x321   :  { %v239_v26 = vadd.f32 %v238_v8, %v237_v23  ;;  %v232_v27 = vadd.f32 %v231_v25, %v230_v24 }
 0x323   :  { %v249_v28 = vsel %vm160_vm1, %v239_v26, %v232_v27 }
 0x324   :  { %253 = vst.msk [vmem:[#allocation8 + $0x2] sm:$0x3] %vm252_vm7, %v249_v28 }
 0x325   :  { %266 = dma.vmem_to_hbm [thread:$0]  %s259_s7, 64, %s261_s10, [#allocation4], %s421_s11, %s421_s11, %s422_s12  }
 0x326   :  { %409 = dma.done.wait [#allocation4], 64  }
 0x327   :  { %410 = vsyncadd [#allocation4], 4294967232 }
 0x328   :  { %271 = vsyncpa [#allocation3], 1 }
 0x329   :  { %272 = vsyncpa [#allocation6], 1 }
 0x32a   :  { %273 = vsyncpa [#allocation4], 1 }

</bundles_post_ra>
